<compile_context>
chip_gen: v7x
topology: tpu7x:2x2x1
jax: 0.10.0
libtpu: 0.0.40
codegen_flags: <defaults>
</compile_context>

<pallas_src>
import functools

import jax
import jax.numpy as jnp
from jax import lax
from jax.experimental import pallas as pl
from jax.experimental.pallas import tpu as pltpu


def _round_up(x, m):
    return ((x + m - 1) // m) * m


def _hloss_kernel(x_ref, p_ref, colsum_ref, ent_ref, *,
                  n_rows, nt, tile_n, mask_rows):
    s = pl.program_id(0)      # batch split ("parallel"; one per TC on v7x)
    i = pl.program_id(1)      # row tile within the split ("arbitrary")

    # Zero the per-split accumulators at the start of each split.
    @pl.when(i == 0)
    def _():
        colsum_ref[...] = jnp.zeros_like(colsum_ref)
        ent_ref[...] = jnp.zeros_like(ent_ref)

    x = x_ref[...].astype(jnp.float32)                     # (tile_n, C)
    c = x.shape[1]

    # Softmax over the class (lane) axis.  The block spans the full class
    # extent, so no lane masking is needed.
    x_max = jnp.max(x, axis=1, keepdims=True)               # (tile_n, 1)
    xs = x - x_max
    e = jnp.exp(xs)
    denom = jnp.sum(e, axis=1, keepdims=True)               # (tile_n, 1)
    p = e / denom                                           # exact normalization
    # log-softmax identity: one log per row instead of one per element.
    logp = xs - jnp.log(denom)

    if mask_rows:
        # Row offset uses the *unclamped* tile index, so duplicate/overhanging
        # tiles contribute nothing to the accumulators.
        row0 = (s * nt + i) * tile_n
        row = lax.broadcasted_iota(jnp.int32, (tile_n, 1), 0)
        row_valid = (row + row0) < n_rows                   # (tile_n, 1)
        ent_contrib = jnp.where((p >= 1e-6) & row_valid, p * logp, 0.0)
        p_rows = jnp.where(row_valid, p, 0.0)
    else:
        ent_contrib = jnp.where(p >= 1e-6, p * logp, 0.0)
        p_rows = p

    # Masked entropy accumulation: lane reduce then sublane reduce.
    ent_tile = jnp.sum(ent_contrib, axis=1, keepdims=True)  # (tile_n, 1)
    ent_ref[...] += jnp.sum(ent_tile, axis=0, keepdims=True).reshape(1, 1, 1)

    # Column sums of p over valid rows (for prob2 = clamp(1 - colsum, 0)).
    colsum_ref[...] += jnp.sum(p_rows, axis=0, keepdims=True).reshape(1, 1, c)

    # Probabilities output (+1e-5).  Writes to rows beyond N are clipped by
    # the pipeline, so no wrapper-side slicing is needed.
    p_ref[...] = (p + 1e-5).astype(p_ref.dtype)


def _device_kind():
    try:
        return jax.devices()[0].device_kind.lower()
    except Exception:
        return ""


def hloss(x, *, n_splits=None, tile_n_cap=1024):
    """x: (N, C) logits. Returns (loss: scalar f32, probs_plus_eps: (N, C))."""
    n, c = x.shape
    out_dtype = x.dtype
    itemsize = jnp.dtype(x.dtype).itemsize
    sublane = max(8, 32 // itemsize)        # 8 for f32, 16 for bf16, 32 for int8

    # Per-generation defaults: v7x has 2 TensorCores but only 64 MiB VMEM;
    # v5e/v6e have a single TC and 128 MiB VMEM (scoped default is small, so
    # raise vmem_limit_bytes explicitly).
    kind = _device_kind()
    if "v7" in kind:
        default_splits, vmem_budget, vmem_limit = 2, 24 << 20, 48 << 20
    else:
        default_splits, vmem_budget, vmem_limit = 1, 48 << 20, 96 << 20
    if n_splits is None:
        n_splits = default_splits
    n_splits = max(1, min(n_splits, pl.cdiv(n, sublane)))

    # Row tile sized against the VMEM budget: double-buffered in+out tiles
    # plus ~6 live full-tile f32 temporaries inside the body.
    bytes_per_row = 2 * c * (itemsize + jnp.dtype(out_dtype).itemsize) + 6 * c * 4
    tile_cap = max(sublane, (vmem_budget // bytes_per_row) // sublane * sublane)
    tile_cap = max(sublane, min(tile_cap, tile_n_cap))

    rows_per_split = pl.cdiv(n, n_splits)
    nt = pl.cdiv(rows_per_split, tile_cap)
    tile_n = _round_up(pl.cdiv(rows_per_split, nt), sublane)
    if n < sublane:
        tile_n = n                            # single block == full (tiny) batch
    elif tile_n > n:
        tile_n = (n // sublane) * sublane     # keep block within the array extent
    nt = pl.cdiv(rows_per_split, tile_n)

    num_tiles = pl.cdiv(n, tile_n)            # row tiles actually covering x
    last_tile = num_tiles - 1
    mask_rows = (n_splits * nt * tile_n) > n  # any partial / duplicate tile?

    def row_map(s, i):
        # Clamp so overhanging grid points re-visit the last valid block; their
        # accumulator contributions are zeroed via row masking in the kernel
        # and their (identical) probs writes are idempotent.
        return (jnp.minimum(s * nt + i, last_tile), 0)

    kernel = functools.partial(_hloss_kernel, n_rows=n, nt=nt, tile_n=tile_n,
                               mask_rows=mask_rows)

    probs, colsum_p, ent_p = pl.pallas_call(
        kernel,
        grid=(n_splits, nt),
        in_specs=[pl.BlockSpec((tile_n, c), row_map)],
        out_specs=(
            pl.BlockSpec((tile_n, c), row_map),
            pl.BlockSpec((1, 1, c), lambda s, i: (s, 0, 0)),
            pl.BlockSpec((1, 1, 1), lambda s, i: (s, 0, 0)),
        ),
        out_shape=(
            jax.ShapeDtypeStruct((n, c), out_dtype),
            jax.ShapeDtypeStruct((n_splits, 1, c), jnp.float32),
            jax.ShapeDtypeStruct((n_splits, 1, 1), jnp.float32),
        ),
        compiler_params=pltpu.CompilerParams(
            dimension_semantics=("parallel", "arbitrary"),
            vmem_limit_bytes=vmem_limit),
    )(x)

    # Tiny epilogue: combine per-split partials and finalize the scalar loss.
    colsum = jnp.sum(colsum_p, axis=0)[0]                   # (C,)
    prob2 = jnp.maximum(1.0 - colsum, 0.0)
    entropy = -jnp.sum(ent_p)
    loss = entropy / jnp.float32(n) + jnp.sum(prob2) / jnp.float32(c)
    return loss, probs


def _hloss_ref(x):
    """Pure-JAX reference mirroring the PyTorch forward."""
    x = x.astype(jnp.float32)
    p = jax.nn.softmax(x, axis=1)
    prob2 = jnp.maximum(1.0 - jnp.sum(p, axis=0), 0.0)
    mask = p >= 1e-6
    plogp = jnp.where(mask, p * jnp.log(jnp.where(mask, p, 1.0)), 0.0)
    entropy = -jnp.sum(plogp)
    loss = entropy / x.shape[0] + jnp.sum(prob2) / x.shape[1]
    return loss, p + 1e-5


if __name__ == "__main__":
    key = jax.random.PRNGKey(0)

    # Small demo shapes: aligned, unaligned (partial-tile masking path), and an
    # explicit 2-split case exercising the per-split accumulators / clamping.
    cases = [((8, 32), None), ((13, 10), None), ((24, 20), 2)]
    for (N, C), splits in cases:
        x = jax.random.normal(jax.random.fold_in(key, 100 * N + C), (N, C),
                              dtype=jnp.float32)

        if splits is None:
            loss, probs = hloss(x)
        else:
            loss, probs = hloss(x, n_splits=splits)
        jax.block_until_ready((loss, probs))

        ref_loss, ref_probs = _hloss_ref(x)
        assert jnp.allclose(loss, ref_loss, atol=1e-4, rtol=1e-4), (N, C, loss, ref_loss)
        assert jnp.allclose(probs, ref_probs, atol=1e-4, rtol=1e-4), (N, C)

    print("KERNEL_OK")
</pallas_src>

<mosaic_0001>
module attributes {stable_mosaic.version = 11 : i64} {
  func.func @_hloss_kernel(%arg0: i32, %arg1: i32, %arg2: memref<8x32xf32, #tpu.memory_space<vmem>>, %arg3: memref<8x32xf32, #tpu.memory_space<vmem>>, %arg4: memref<1x1x32xf32, #tpu.memory_space<vmem>>, %arg5: memref<1x1x1xf32, #tpu.memory_space<vmem>>) attributes {dimension_semantics = [#tpu.dimension_semantics<parallel>, #tpu.dimension_semantics<arbitrary>], iteration_bounds = array<i64: 1, 1>, scalar_prefetch = 0 : i64, scratch_operands = 0 : i64, tpu.core_type = #tpu.core_type<tc>, window_params = [{transform_indices = @transform_0, window_bounds = array<i64: 8, 32>}, {transform_indices = @transform_1, window_bounds = array<i64: 8, 32>}, {transform_indices = @transform_2, window_bounds = array<i64: 1, 1, 32>}, {transform_indices = @transform_3, window_bounds = array<i64: 1, 1, 1>}]} {
    %c0_i32 = arith.constant 0 : i32
    %0 = arith.cmpi eq, %arg1, %c0_i32 : i32
    %1 = arith.extui %0 : i1 to i32
    %c0_i32_0 = arith.constant 0 : i32
    %2 = arith.cmpi ne, %1, %c0_i32_0 : i32
    scf.if %2 {
      %cst_23 = arith.constant 0.000000e+00 : f32
      %38 = vector.broadcast %cst_23 : f32 to vector<1x1x32xf32>
      %c0_24 = arith.constant 0 : index
      %c0_25 = arith.constant 0 : index
      %c0_26 = arith.constant 0 : index
      %39 = vector.load %arg4[%c0_24, %c0_25, %c0_26] : memref<1x1x32xf32, #tpu.memory_space<vmem>>, vector<1x1x32xf32>
      tpu.vector_store %arg4[%c0_24, %c0_25, %c0_26], %38 {strides = array<i32>} : memref<1x1x32xf32, #tpu.memory_space<vmem>>, vector<1x1x32xf32>,
      %cst_27 = arith.constant 0.000000e+00 : f32
      %40 = vector.broadcast %cst_27 : f32 to vector<1x1x1xf32>
      %c0_28 = arith.constant 0 : index
      %c0_29 = arith.constant 0 : index
      %c0_30 = arith.constant 0 : index
      %41 = vector.load %arg5[%c0_28, %c0_29, %c0_30] : memref<1x1x1xf32, #tpu.memory_space<vmem>>, vector<1x1x1xf32>
      tpu.vector_store %arg5[%c0_28, %c0_29, %c0_30], %40 {strides = array<i32>} : memref<1x1x1xf32, #tpu.memory_space<vmem>>, vector<1x1x1xf32>,
    } else {
    }
    %c0 = arith.constant 0 : index
    %c0_1 = arith.constant 0 : index
    %3 = vector.load %arg2[%c0, %c0_1] : memref<8x32xf32, #tpu.memory_space<vmem>>, vector<8x32xf32>
    %cst = arith.constant dense<0xFF800000> : vector<8xf32>
    %4 = vector.multi_reduction <maximumf>, %3, %cst [1] : vector<8x32xf32> to vector<8xf32>
    %5 = vector.shape_cast %4 : vector<8xf32> to vector<8x1xf32>
    %6 = vector.broadcast %5 : vector<8x1xf32> to vector<8x32xf32>
    %7 = arith.subf %3, %6 : vector<8x32xf32>
    %8 = math.exp %7 : vector<8x32xf32>
    %cst_2 = arith.constant dense<0.000000e+00> : vector<8xf32>
    %9 = vector.multi_reduction <add>, %8, %cst_2 [1] : vector<8x32xf32> to vector<8xf32>
    %10 = vector.shape_cast %9 : vector<8xf32> to vector<8x1xf32>
    %11 = vector.broadcast %10 : vector<8x1xf32> to vector<8x32xf32>
    %12 = arith.divf %8, %11 : vector<8x32xf32>
    %13 = math.log %10 : vector<8x1xf32>
    %14 = vector.broadcast %13 : vector<8x1xf32> to vector<8x32xf32>
    %15 = arith.subf %7, %14 : vector<8x32xf32>
    %cst_3 = arith.constant 9.99999997E-7 : f32
    %16 = vector.broadcast %cst_3 : f32 to vector<8x32xf32>
    %17 = arith.cmpf oge, %12, %16 : vector<8x32xf32>
    %18 = arith.mulf %12, %15 : vector<8x32xf32>
    %cst_4 = arith.constant 0.000000e+00 : f32
    %19 = vector.broadcast %cst_4 : f32 to vector<8x32xf32>
    %20 = arith.select %17, %18, %19 : vector<8x32xi1>, vector<8x32xf32>
    %cst_5 = arith.constant dense<0.000000e+00> : vector<8xf32>
    %21 = vector.multi_reduction <add>, %20, %cst_5 [1] : vector<8x32xf32> to vector<8xf32>
    %22 = vector.shape_cast %21 : vector<8xf32> to vector<8x1xf32>
    %c0_6 = arith.constant 0 : index
    %c0_7 = arith.constant 0 : index
    %c0_8 = arith.constant 0 : index
    %23 = vector.load %arg5[%c0_6, %c0_7, %c0_8] : memref<1x1x1xf32, #tpu.memory_space<vmem>>, vector<1x1x1xf32>
    %cst_9 = arith.constant dense<0.000000e+00> : vector<1xf32>
    %24 = vector.multi_reduction <add>, %22, %cst_9 [0] : vector<8x1xf32> to vector<1xf32>
    %25 = vector.shape_cast %24 : vector<1xf32> to vector<1x1xf32>
    %26 = vector.shape_cast %25 : vector<1x1xf32> to vector<1x1x1xf32>
    %27 = arith.addf %23, %26 : vector<1x1x1xf32>
    %c0_10 = arith.constant 0 : index
    %c0_11 = arith.constant 0 : index
    %c0_12 = arith.constant 0 : index
    %28 = vector.load %arg5[%c0_10, %c0_11, %c0_12] : memref<1x1x1xf32, #tpu.memory_space<vmem>>, vector<1x1x1xf32>
    tpu.vector_store %arg5[%c0_10, %c0_11, %c0_12], %27 {strides = array<i32>} : memref<1x1x1xf32, #tpu.memory_space<vmem>>, vector<1x1x1xf32>,
    %c0_13 = arith.constant 0 : index
    %c0_14 = arith.constant 0 : index
    %c0_15 = arith.constant 0 : index
    %29 = vector.load %arg4[%c0_13, %c0_14, %c0_15] : memref<1x1x32xf32, #tpu.memory_space<vmem>>, vector<1x1x32xf32>
    %cst_16 = arith.constant dense<0.000000e+00> : vector<32xf32>
    %30 = vector.multi_reduction <add>, %12, %cst_16 [0] : vector<8x32xf32> to vector<32xf32>
    %31 = vector.shape_cast %30 : vector<32xf32> to vector<1x32xf32>
    %32 = vector.shape_cast %31 : vector<1x32xf32> to vector<1x1x32xf32>
    %33 = arith.addf %29, %32 : vector<1x1x32xf32>
    %c0_17 = arith.constant 0 : index
    %c0_18 = arith.constant 0 : index
    %c0_19 = arith.constant 0 : index
    %34 = vector.load %arg4[%c0_17, %c0_18, %c0_19] : memref<1x1x32xf32, #tpu.memory_space<vmem>>, vector<1x1x32xf32>
    tpu.vector_store %arg4[%c0_17, %c0_18, %c0_19], %33 {strides = array<i32>} : memref<1x1x32xf32, #tpu.memory_space<vmem>>, vector<1x1x32xf32>,
    %cst_20 = arith.constant 9.99999974E-6 : f32
    %35 = vector.broadcast %cst_20 : f32 to vector<8x32xf32>
    %36 = arith.addf %12, %35 : vector<8x32xf32>
    %c0_21 = arith.constant 0 : index
    %c0_22 = arith.constant 0 : index
    %37 = vector.load %arg3[%c0_21, %c0_22] : memref<8x32xf32, #tpu.memory_space<vmem>>, vector<8x32xf32>
    tpu.vector_store %arg3[%c0_21, %c0_22], %36 {strides = array<i32>} : memref<8x32xf32, #tpu.memory_space<vmem>>, vector<8x32xf32>,
    return
  }
  func.func @transform_0(%arg0: i32, %arg1: i32) -> (i32, i32) {
    %c1_i32 = arith.constant 1 : i32
    %0 = arith.muli %arg0, %c1_i32 : i32
    %1 = arith.addi %0, %arg1 : i32
    %c0_i32 = arith.constant 0 : i32
    %2 = arith.minsi %1, %c0_i32 : i32
    %c0_i32_0 = arith.constant 0 : i32
    %c0_i32_1 = arith.constant 0 : i32
    return %2, %c0_i32_0 : i32, i32
  }
  func.func @transform_1(%arg0: i32, %arg1: i32) -> (i32, i32) {
    %c1_i32 = arith.constant 1 : i32
    %0 = arith.muli %arg0, %c1_i32 : i32
    %1 = arith.addi %0, %arg1 : i32
    %c0_i32 = arith.constant 0 : i32
    %2 = arith.minsi %1, %c0_i32 : i32
    %c0_i32_0 = arith.constant 0 : i32
    %c0_i32_1 = arith.constant 0 : i32
    return %2, %c0_i32_0 : i32, i32
  }
  func.func @transform_2(%arg0: i32, %arg1: i32) -> (i32, i32, i32) {
    %c0_i32 = arith.constant 0 : i32
    %c0_i32_0 = arith.constant 0 : i32
    %c0_i32_1 = arith.constant 0 : i32
    return %arg0, %c0_i32, %c0_i32_0 : i32, i32, i32
  }
  func.func @transform_3(%arg0: i32, %arg1: i32) -> (i32, i32, i32) {
    %c0_i32 = arith.constant 0 : i32
    %c0_i32_0 = arith.constant 0 : i32
    %c0_i32_1 = arith.constant 0 : i32
    return %arg0, %c0_i32, %c0_i32_0 : i32, i32, i32
  }
}

</mosaic_0001>

<bundles_post_ra>
// kernel: tpu_custom_call.1
= control target key start
LH: loop header
LB: loop body
LE: loop exit
PB: predicated region body
PF: predicated region fallthrough
CT: control target
= control target key end

     0   :  { %9 = vsyncpa [#allocation3], 0  ;;  %s327_s0 = inlined_call_operand.hbm [shape: f32[8,32], index: 0, kind: input, shape index: {}]   ;;  %s328_s1 = inlined_call_operand.hbm [shape: f32[8,32], index: 1, kind: output, shape index: {0}]   ;;  %s329_s2 = inlined_call_operand.hbm [shape: f32[1,1,32], index: 2, kind: output, shape index: {1}]   ;;  %s330_s3 = inlined_call_operand.hbm [shape: f32[1,1,1], index: 3, kind: output, shape index: {2}]  }
   0x1   :  { %10 = vsyncpa [#allocation4], 0 }
   0x2   :  { %11 = vsyncpa [#allocation7], 0  ;;  %s245_s12 = smov [#allocation2]   ;;  %s151_s16 = scalar_lea.hbm %s327_s0, 128 }
   0x3   :  { %s23_s13 = sshll.u32 %s245_s12, 4  ;;  %p152_p0 = scmp.ne.s32.totalorder %s327_s0, %s151_s16  ;;  %s24_s13 = int_to_ptr.vmem [resolvable:$true] %s23_s13 }
   0x4   :  { %p155_p1 = scmp.lt.u32.totalorder %s151_s16, %s327_s0 }
   0x6   :  { %p157_p2 = pnand %p155_p1, %p152_p0 }
   0x8   :  { %160 = shalt.err (!%p157_p2)
}
   0x9   :  { %s161_s21 = scalar_lea.vmem %s24_s13, 128  ;;  %p166_p4 = scmp.lt.s32.totalorder %s24_s13, %s24_s13 }
   0xa   :  { %p162_p3 = scmp.ne.s32.totalorder %s24_s13, %s161_s21  ;;  %p167_p5 = scmp.lt.s32.totalorder %s161_s21, %s161_s21 }
   0xc   :  { %p168_p6 = por %p167_p5, %p166_p4 }
   0xe   :  { %p169_p7 = pnand %p168_p6, %p162_p3 }
  0x10   :  { %172 = shalt.err (!%p169_p7)
}
  0x11   :  { %26 = dma.hbm_to_vmem [thread:$0]  %s327_s0, 128, %s24_s13, [#allocation3]  }
  0x12   :  { %239 = dma.done.wait [#allocation3], 128  }
  0x13   :  { %240 = vsyncadd [#allocation3], 4294967168  ;;  %vm42_vm0 = vcmask 0   ;;  %v246_v0 = vmov 0.0   ;;  %vm45_vm1 = vcmask 261120   ;;  %v44_v1 = vld [vmem:[#allocation2] sm:$0xff] }
  0x14   :  { %43 = vst.msk [vmem:[#allocation8] sm:$0x1] %vm42_vm0, %v246_v0  ;;  %v46_v2 = vsel %vm45_vm1, %v44_v1, -inf  ;;  %vm40_vm2 = vcmask 253952   ;;  %s247_s0 = smov [#allocation6]   ;;  %s248_s25 = smov [#allocation5]  }
  0x15   :  { %47 = vmax.xlane.f32.xlu0 %v46_v2  ;;  %41 = vst.msk [vmem:[#allocation6] sm:$0x1] %vm40_vm2, %v246_v0  ;;  %s110_s24 = sshll.u32 %s247_s0, 4  ;;  %s100_s26 = sshll.u32 %s248_s25, 4  ;;  %s111_s24 = int_to_ptr.vmem [resolvable:$true] %s110_s24  ;;  %s101_s26 = int_to_ptr.vmem [resolvable:$true] %s100_s26 }
  0x16   :  { %s173_s27 = scalar_lea.vmem %s111_s24, 16  ;;  %s177_s28 = scalar_lea.vmem %s111_s24, 32 }
  0x17   :  { %p174_p8 = scmp.ne.s32.totalorder %s111_s24, %s173_s27  ;;  %p178_p9 = scmp.lt.s32.totalorder %s111_s24, %s111_s24 }
  0x18   :  { %p179_p10 = scmp.lt.s32.totalorder %s177_s28, %s173_s27 }
  0x1a   :  { %p180_p11 = por %p179_p10, %p178_p9 }
  0x1c   :  { %v76_v24 = vld [vmem:[#allocation6] sm:$0x1]  ;;  %p181_p12 = pnand %p180_p11, %p174_p8 }
  0xa2   :  { %v48_v3 = vpop.xlane.xlu0 %47 }
  0xa3   :  { %v49_v4 = vsub.f32 %v44_v1, %v48_v3 }
  0xa5   :  { %v50_v5 = vmul.f32 1.442695, %v49_v4 }
  0xa7   :  { %145 = vpow2.f32 %v50_v5 }
  0xb1   :  { %v146_v6 = vpop.eup %145 }
  0xb2   :  { %v52_v7 = vsel %vm45_vm1, %v146_v6, 0.0 }
  0xb3   :  { %53 = vadd.xlane.f32.xlu0 %v52_v7 }
 0x140   :  { %v54_v8 = vpop.xlane.xlu0 %53 }
 0x141   :  { %147 = vrcp.f32 %v54_v8 }
 0x142   :  { %149 = vlog2.f32 %v54_v8 }
 0x14b   :  { %v148_v9 = vpop.eup %147 }
 0x14c   :  { %v150_v10 = vpop.eup %149  ;;  %v56_v11 = vmul.f32 %v148_v9, %v146_v6 }
 0x14d   :  { %v58_v12 = vmul.f32 0.6931472, %v150_v10 }
 0x14e   :  { %v77_v13 = vsel %vm45_vm1, %v56_v11, 0.0  ;;  %v87_v14 = vadd.f32 1e-05, %v56_v11  ;;  %vm60_vm3 = vcmp.ge.f32.partialorder %v56_v11, 1e-06 }
 0x14f   :  { %v59_v15 = vsub.f32 %v49_v4, %v58_v12  ;;  %v78_v16 = vrot.slane %v77_v13, 4 }
 0x150   :  { %88 = vst.msk [vmem:[#allocation5] sm:$0xff] %vm45_vm1, %v87_v14 }
 0x151   :  { %v61_v17 = vmul.f32 %v59_v15, %v56_v11  ;;  %v79_v18 = vadd.f32 %v78_v16, %v77_v13 }
 0x153   :  { %v62_v19 = vsel %vm60_vm3, %v61_v17, 0.0  ;;  %v80_v20 = vrot.slane %v79_v18, 2 }
 0x154   :  { %v63_v21 = vsel %vm45_vm1, %v62_v19, 0.0 }
 0x155   :  { %64 = vadd.xlane.f32.xlu1 %v63_v21  ;;  %v81_v22 = vadd.f32 %v80_v20, %v79_v18 }
 0x157   :  { %v82_v23 = vrot.slane %v81_v22, 1 }
 0x159   :  { %v83_v25 = vadd.f32 %v82_v23, %v81_v22 }
 0x15b   :  { %v84_v26 = vadd.f32 %v83_v25, %v76_v24 }
 0x15d   :  { %86 = vst.msk [vmem:[#allocation6] sm:$0x1] %vm40_vm2, %v84_v26 }
 0x15e   :  { %184 = shalt.err (!%p181_p12)
}
 0x15f   :  { %s185_s4 = scalar_lea.hbm %s329_s2, 16 }
 0x160   :  { %p186_p13 = scmp.ne.s32.totalorder %s329_s2, %s185_s4  ;;  %p189_p0 = scmp.lt.u32.totalorder %s185_s4, %s329_s2 }
 0x162   :  { %p191_p1 = pnand %p189_p0, %p186_p13 }
 0x164   :  { %194 = shalt.err (!%p191_p1)
}
 0x165   :  { %113 = dma.vmem_to_hbm [thread:$0]  %s111_s24, 16, %s329_s2, [#allocation7]  }
 0x166   :  { %s195_s11 = scalar_lea.vmem %s101_s26, 128  ;;  %p200_p3 = scmp.lt.s32.totalorder %s101_s26, %s101_s26 }
 0x167   :  { %p196_p2 = scmp.ne.s32.totalorder %s101_s26, %s195_s11  ;;  %p201_p4 = scmp.lt.s32.totalorder %s195_s11, %s195_s11 }
 0x169   :  { %p202_p5 = por %p201_p4, %p200_p3 }
 0x16b   :  { %p203_p6 = pnand %p202_p5, %p196_p2 }
 0x16d   :  { %206 = shalt.err (!%p203_p6)
}
 0x16e   :  { %s207_s14 = scalar_lea.hbm %s328_s1, 128 }
 0x16f   :  { %p208_p7 = scmp.ne.s32.totalorder %s328_s1, %s207_s14  ;;  %p211_p8 = scmp.lt.u32.totalorder %s207_s14, %s328_s1 }
 0x171   :  { %p213_p9 = pnand %p211_p8, %p208_p7 }
 0x173   :  { %216 = shalt.err (!%p213_p9)
}
 0x174   :  { %103 = dma.vmem_to_hbm [thread:$0]  %s101_s26, 128, %s328_s1, [#allocation4]   ;;  %v66_v33 = vld [vmem:[#allocation8] sm:$0x1] }
 0x175   :  { %s249_s20 = smov [#allocation8]  }
 0x176   :  { %s120_s21 = sshll.u32 %s249_s20, 4  ;;  %s121_s21 = int_to_ptr.vmem [resolvable:$true] %s120_s21 }
 0x177   :  { %s217_s22 = scalar_lea.vmem %s121_s21, 16  ;;  %s221_s23 = scalar_lea.vmem %s121_s21, 32 }
 0x178   :  { %p218_p10 = scmp.ne.s32.totalorder %s121_s21, %s217_s22  ;;  %p222_p11 = scmp.lt.s32.totalorder %s121_s21, %s121_s21 }
 0x179   :  { %p223_p12 = scmp.lt.s32.totalorder %s221_s23, %s217_s22 }
 0x17b   :  { %p224_p13 = por %p223_p12, %p222_p11 }
 0x17d   :  { %p225_p0 = pnand %p224_p13, %p218_p10 }
 0x1e2   :  { %v65_v27 = vpop.xlane.xlu1 %64 }
 0x1e3   :  { %v67_v28 = vrot.slane %v65_v27, 4 }
 0x1e5   :  { %v68_v29 = vadd.f32 %v67_v28, %v65_v27 }
 0x1e7   :  { %v69_v30 = vrot.slane %v68_v29, 2 }
 0x1e9   :  { %v70_v31 = vadd.f32 %v69_v30, %v68_v29 }
 0x1eb   :  { %v71_v32 = vrot.slane %v70_v31, 1 }
 0x1ed   :  { %v72_v34 = vadd.f32 %v71_v32, %v70_v31 }
 0x1ef   :  { %v73_v35 = vadd.f32 %v72_v34, %v66_v33 }
 0x1f1   :  { %75 = vst.msk [vmem:[#allocation8] sm:$0x1] %vm42_vm0, %v73_v35 }
 0x1f2   :  { %228 = shalt.err (!%p225_p0)
}
 0x1f3   :  { %s229_s24 = scalar_lea.hbm %s330_s3, 16 }
 0x1f4   :  { %p230_p1 = scmp.ne.s32.totalorder %s330_s3, %s229_s24  ;;  %p233_p2 = scmp.lt.u32.totalorder %s229_s24, %s330_s3 }
 0x1f6   :  { %p235_p3 = pnand %p233_p2, %p230_p1 }
 0x1f8   :  { %238 = shalt.err (!%p235_p3)
}
 0x1f9   :  { %123 = dma.vmem_to_hbm [thread:$0]  %s121_s21, 16, %s330_s3, [#allocation7]  }
 0x1fa   :  { %241 = dma.done.wait [#allocation4], 128  }
 0x1fb   :  { %242 = vsyncadd [#allocation4], 4294967168 }
 0x1fc   :  { %243 = dma.done.wait [#allocation7], 32  }
 0x1fd   :  { %244 = vsyncadd [#allocation7], 4294967264 }
 0x1fe   :  { %133 = vsyncpa [#allocation3], 1 }
 0x1ff   :  { %134 = vsyncpa [#allocation4], 1 }
 0x200   :  { %135 = vsyncpa [#allocation7], 1 }

</bundles_post_ra>
